<compile_context>
chip_gen: v7x
topology: tpu7x:2x2x1
jax: 0.10.0
libtpu: 0.0.40
codegen_flags: <defaults>
</compile_context>

<pallas_src>
import functools

import jax
import jax.numpy as jnp
from jax.experimental import pallas as pl
from jax.experimental.pallas import tpu as pltpu


def _cdiv(a, b):
    return -(-a // b)


def _mymodel_kernel(img_ref, mask_ref, pred_ref, loss_ref, *, inv_c):
    # dense path : img (C, tR, L), mask/pred (tR, L), loss (C, tR, L)
    # fallback   : img (C, tHW),   mask/pred (1, tHW), loss (C, tHW)
    img = img_ref[...]
    msk = mask_ref[...]

    # channel mean = C-way sum * (1/C) constant
    keep = img_ref.ndim == pred_ref.ndim
    pm = jnp.sum(img, axis=0, keepdims=keep) * inv_c
    pm = jnp.clip(pm, 0.0, 1.0)
    # torch .to(torch.uint8) truncates toward zero; pm in [0,1] so (pm*255) -> floor.
    # /255 folded into *(1/255).
    pm = jnp.floor(pm * 255.0) * (1.0 / 255.0)
    pred_ref[...] = pm.astype(pred_ref.dtype)

    # elementwise squared error; mask broadcasts over the channel axis
    diff = img - msk
    loss_ref[...] = (diff * diff).astype(loss_ref.dtype)


# Double-buffered block footprint budget (2 buffers x (image + loss + mask + pred)).
# ~20 MiB keeps a comfortable margin under v7x's 64 MiB physical VMEM while still
# giving >= 512^2-element tiles (the measured ~85%-of-roofline streaming point).
_FOOTPRINT_BUDGET_BYTES = 20 << 20
_VMEM_LIMIT_BYTES = 48 << 20
_MIN_GRID_STEPS = 8  # keep both v7x TensorCores fed when N is small


def _max_tile_elems(C):
    bytes_per_elem_per_step = 2 * (2 * C + 2) * 4  # 2 buffers, f32
    return max(8 * 128, _FOOTPRINT_BUDGET_BYTES // bytes_per_elem_per_step)


def _choose_lane(hw):
    """Largest multiple-of-128 lane width that divides H*W (None if none exists)."""
    for lane in (1024, 512, 256, 128):
        if hw % lane == 0:
            return lane
    return None


def mymodel_forward(image, mask, name, param=None):
    """JAX/Pallas port of MyModel.forward.

    image: [N, C, H, W] float32
    mask:  [N, 1, H, W] float32
    name:  list of str keys, e.g. ["01.jpg", ...]
    param: unused in forward (mirrors the unused nn.Parameter in the PyTorch module)
    """
    N, C, H, W = image.shape
    assert mask.shape == (N, 1, H, W)
    HW = H * W

    inv_c = 1.0 / C
    kernel = functools.partial(_mymodel_kernel, inv_c=inv_c)
    max_elems = _max_tile_elems(C)
    lane = _choose_lane(HW)

    if lane is not None:
        # ---- sublane+lane dense layout: (N, C, R, L) / (N, 1, R, L) --------------
        R = HW // lane
        img2 = image.reshape(N, C, R, lane)
        msk2 = mask.reshape(N, 1, R, lane)

        if R <= 8:
            t_rows = R  # full extent (allowed even if not a multiple of 8)
        else:
            budget_rows = max(8, (max_elems // lane) // 8 * 8)
            t_rows = min(budget_rows, (R // 8) * 8)
            # prefer more grid steps over one giant tile when the batch is small
            while N * _cdiv(R, t_rows) < _MIN_GRID_STEPS and t_rows > 8:
                t_rows = max(8, (t_rows // 2) // 8 * 8)
        n_tiles = _cdiv(R, t_rows)

        pred2, loss2 = pl.pallas_call(
            kernel,
            out_shape=(
                jax.ShapeDtypeStruct((N, 1, R, lane), jnp.float32),  # pred_mask
                jax.ShapeDtypeStruct((N, C, R, lane), jnp.float32),  # backward_loss
            ),
            grid_spec=pltpu.PrefetchScalarGridSpec(
                num_scalar_prefetch=0,
                grid=(N, n_tiles),
                in_specs=[
                    pl.BlockSpec((None, C, t_rows, lane), lambda n, r: (n, 0, r, 0)),
                    pl.BlockSpec((None, None, t_rows, lane), lambda n, r: (n, 0, r, 0)),
                ],
                out_specs=(
                    pl.BlockSpec((None, None, t_rows, lane), lambda n, r: (n, 0, r, 0)),
                    pl.BlockSpec((None, C, t_rows, lane), lambda n, r: (n, 0, r, 0)),
                ),
            ),
            compiler_params=pltpu.CompilerParams(
                dimension_semantics=("parallel", "parallel"),
                vmem_limit_bytes=_VMEM_LIMIT_BYTES,
            ),
        )(img2, msk2)
    else:
        # ---- fallback (H*W not a multiple of 128): lane-dense tiles + cdiv -------
        img2 = image.reshape(N, C, HW)
        msk2 = mask.reshape(N, 1, HW)

        if HW <= 128:
            t_hw = HW  # full extent
        else:
            budget = max(128, (max_elems // 128) * 128)
            t_hw = min(budget, (HW // 128) * 128)
            while N * _cdiv(HW, t_hw) < _MIN_GRID_STEPS and t_hw > 128:
                t_hw = max(128, (t_hw // 2) // 128 * 128)
        n_tiles = _cdiv(HW, t_hw)

        pred2, loss2 = pl.pallas_call(
            kernel,
            out_shape=(
                jax.ShapeDtypeStruct((N, 1, HW), jnp.float32),  # pred_mask
                jax.ShapeDtypeStruct((N, C, HW), jnp.float32),  # backward_loss
            ),
            grid_spec=pltpu.PrefetchScalarGridSpec(
                num_scalar_prefetch=0,
                grid=(N, n_tiles),
                in_specs=[
                    pl.BlockSpec((None, C, t_hw), lambda n, s: (n, 0, s)),
                    pl.BlockSpec((None, 1, t_hw), lambda n, s: (n, 0, s)),
                ],
                out_specs=(
                    pl.BlockSpec((None, 1, t_hw), lambda n, s: (n, 0, s)),
                    pl.BlockSpec((None, C, t_hw), lambda n, s: (n, 0, s)),
                ),
            ),
            compiler_params=pltpu.CompilerParams(
                dimension_semantics=("parallel", "parallel"),
                vmem_limit_bytes=_VMEM_LIMIT_BYTES,
            ),
        )(img2, msk2)

    pred_mask = pred2.reshape(N, 1, H, W)
    loss = loss2.reshape(N, C, H, W)

    # host-side label lookup (fixed per-name labels, as in the reference module)
    pred_label_dict = {
        '01.jpg': 0.1, '02.jpg': 0.2, '03.jpg': 0.3, '04.jpg': 0.4,
        '05.jpg': 0.5, '06.jpg': 0.6, '07.jpg': 0.7, '08.jpg': 0.1,
        '09.jpg': 0.9, '10.jpg': 1.0, '11.jpg': 0.1, '12.jpg': 0.2,
        '13.jpg': 0.3, '14.jpg': 0.4, '15.jpg': 0.5, '16.jpg': 0.6,
        '17.jpg': 0.7, '18.jpg': 0.8, '19.jpg': 0.9, '20.jpg': 1.0,
    }
    pred_label = jnp.asarray([pred_label_dict[n] for n in name], dtype=jnp.float32)

    return {
        'backward_loss': loss,
        'pred_mask': pred_mask,
        'pred_label': pred_label,
        'visual_loss': {},
        'visual_image': {},
    }


if __name__ == "__main__":
    key = jax.random.PRNGKey(0)
    k_param, k_img, k_mask = jax.random.split(key, 3)

    # deterministic "parameter" (unused in forward, as in the PyTorch module)
    param = jax.random.normal(k_param, (1,), dtype=jnp.float32)

    N, C, H, W = 2, 4, 16, 16
    # quantize inputs to multiples of 1/256 so the channel-sum/mean is exact in f32
    # and the floor(pm*255) comparison against the reference is deterministic
    image = jnp.floor(jax.random.uniform(k_img, (N, C, H, W), dtype=jnp.float32) * 256.0) / 256.0
    mask = (jax.random.uniform(k_mask, (N, 1, H, W), dtype=jnp.float32) > 0.5
            ).astype(jnp.float32)
    name = ["01.jpg", "02.jpg"]

    out = mymodel_forward(image, mask, name, param=param)
    jax.block_until_ready(out["backward_loss"])
    jax.block_until_ready(out["pred_mask"])
    jax.block_until_ready(out["pred_label"])

    # lightweight correctness check against a pure-JAX reference
    chan_mean = jnp.sum(image, axis=1, keepdims=True) * (1.0 / C)
    ref_pm = jnp.floor(jnp.clip(chan_mean, 0.0, 1.0) * 255.0) / 255.0
    ref_loss = (image - mask) ** 2
    assert jnp.allclose(out["pred_mask"], ref_pm, atol=1e-6)
    assert jnp.allclose(out["backward_loss"], ref_loss, atol=1e-6)
    assert out["pred_label"].shape == (N,)

    print("KERNEL_OK")
</pallas_src>

<mosaic_0001>
module attributes {stable_mosaic.version = 11 : i64} {
  func.func @_mymodel_kernel(%arg0: i32, %arg1: i32, %arg2: memref<1x4x1x256xf32, #tpu.memory_space<vmem>>, %arg3: memref<1x1x1x256xf32, #tpu.memory_space<vmem>>, %arg4: memref<1x1x1x256xf32, #tpu.memory_space<vmem>>, %arg5: memref<1x4x1x256xf32, #tpu.memory_space<vmem>>) attributes {dimension_semantics = [#tpu.dimension_semantics<parallel>, #tpu.dimension_semantics<parallel>], iteration_bounds = array<i64: 2, 1>, scalar_prefetch = 0 : i64, scratch_operands = 0 : i64, tpu.core_type = #tpu.core_type<tc>, window_params = [{transform_indices = @transform_0, window_bounds = array<i64: 1, 4, 1, 256>}, {transform_indices = @transform_1, window_bounds = array<i64: 1, 1, 1, 256>}, {transform_indices = @transform_2, window_bounds = array<i64: 1, 1, 1, 256>}, {transform_indices = @transform_3, window_bounds = array<i64: 1, 4, 1, 256>}]} {
    %c0 = arith.constant 0 : index
    %c0_0 = arith.constant 0 : index
    %c0_1 = arith.constant 0 : index
    %c0_2 = arith.constant 0 : index
    %0 = vector.load %arg2[%c0, %c0_0, %c0_1, %c0_2] : memref<1x4x1x256xf32, #tpu.memory_space<vmem>>, vector<1x4x1x256xf32>
    %1 = vector.shape_cast %0 : vector<1x4x1x256xf32> to vector<4x1x256xf32>
    %c0_3 = arith.constant 0 : index
    %c0_4 = arith.constant 0 : index
    %c0_5 = arith.constant 0 : index
    %c0_6 = arith.constant 0 : index
    %2 = vector.load %arg3[%c0_3, %c0_4, %c0_5, %c0_6] : memref<1x1x1x256xf32, #tpu.memory_space<vmem>>, vector<1x1x1x256xf32>
    %3 = vector.shape_cast %2 : vector<1x1x1x256xf32> to vector<1x256xf32>
    %cst = arith.constant dense<0.000000e+00> : vector<1x256xf32>
    %4 = vector.multi_reduction <add>, %1, %cst [0] : vector<4x1x256xf32> to vector<1x256xf32>
    %cst_7 = arith.constant 2.500000e-01 : f32
    %5 = vector.broadcast %cst_7 : f32 to vector<1x256xf32>
    %6 = arith.mulf %4, %5 : vector<1x256xf32>
    %cst_8 = arith.constant 0.000000e+00 : f32
    %cst_9 = arith.constant 1.000000e+00 : f32
    %7 = vector.broadcast %cst_8 : f32 to vector<1x256xf32>
    %8 = arith.maximumf %7, %6 : vector<1x256xf32>
    %9 = vector.broadcast %cst_9 : f32 to vector<1x256xf32>
    %10 = arith.minimumf %9, %8 : vector<1x256xf32>
    %cst_10 = arith.constant 2.550000e+02 : f32
    %11 = vector.broadcast %cst_10 : f32 to vector<1x256xf32>
    %12 = arith.mulf %10, %11 : vector<1x256xf32>
    %13 = math.floor %12 : vector<1x256xf32>
    %cst_11 = arith.constant 0.00392156886 : f32
    %14 = vector.broadcast %cst_11 : f32 to vector<1x256xf32>
    %15 = arith.mulf %13, %14 : vector<1x256xf32>
    %c0_12 = arith.constant 0 : index
    %c0_13 = arith.constant 0 : index
    %c0_14 = arith.constant 0 : index
    %c0_15 = arith.constant 0 : index
    %16 = vector.load %arg4[%c0_12, %c0_13, %c0_14, %c0_15] : memref<1x1x1x256xf32, #tpu.memory_space<vmem>>, vector<1x1x1x256xf32>
    %17 = vector.shape_cast %16 : vector<1x1x1x256xf32> to vector<1x256xf32>
    %18 = vector.shape_cast %15 : vector<1x256xf32> to vector<1x1x1x256xf32>
    tpu.vector_store %arg4[%c0_12, %c0_13, %c0_14, %c0_15], %18 {strides = array<i32>} : memref<1x1x1x256xf32, #tpu.memory_space<vmem>>, vector<1x1x1x256xf32>,
    %19 = vector.shape_cast %3 : vector<1x256xf32> to vector<1x1x256xf32>
    %20 = vector.broadcast %19 : vector<1x1x256xf32> to vector<4x1x256xf32>
    %21 = arith.subf %1, %20 : vector<4x1x256xf32>
    %22 = arith.mulf %21, %21 : vector<4x1x256xf32>
    %c0_16 = arith.constant 0 : index
    %c0_17 = arith.constant 0 : index
    %c0_18 = arith.constant 0 : index
    %c0_19 = arith.constant 0 : index
    %23 = vector.load %arg5[%c0_16, %c0_17, %c0_18, %c0_19] : memref<1x4x1x256xf32, #tpu.memory_space<vmem>>, vector<1x4x1x256xf32>
    %24 = vector.shape_cast %23 : vector<1x4x1x256xf32> to vector<4x1x256xf32>
    %25 = vector.shape_cast %22 : vector<4x1x256xf32> to vector<1x4x1x256xf32>
    tpu.vector_store %arg5[%c0_16, %c0_17, %c0_18, %c0_19], %25 {strides = array<i32>} : memref<1x4x1x256xf32, #tpu.memory_space<vmem>>, vector<1x4x1x256xf32>,
    return
  }
  func.func @transform_0(%arg0: i32, %arg1: i32) -> (i32, i32, i32, i32) {
    %c0_i32 = arith.constant 0 : i32
    %c0_i32_0 = arith.constant 0 : i32
    %c0_i32_1 = arith.constant 0 : i32
    return %arg0, %c0_i32, %arg1, %c0_i32_0 : i32, i32, i32, i32
  }
  func.func @transform_1(%arg0: i32, %arg1: i32) -> (i32, i32, i32, i32) {
    %c0_i32 = arith.constant 0 : i32
    %c0_i32_0 = arith.constant 0 : i32
    %c0_i32_1 = arith.constant 0 : i32
    return %arg0, %c0_i32, %arg1, %c0_i32_0 : i32, i32, i32, i32
  }
  func.func @transform_2(%arg0: i32, %arg1: i32) -> (i32, i32, i32, i32) {
    %c0_i32 = arith.constant 0 : i32
    %c0_i32_0 = arith.constant 0 : i32
    %c0_i32_1 = arith.constant 0 : i32
    return %arg0, %c0_i32, %arg1, %c0_i32_0 : i32, i32, i32, i32
  }
  func.func @transform_3(%arg0: i32, %arg1: i32) -> (i32, i32, i32, i32) {
    %c0_i32 = arith.constant 0 : i32
    %c0_i32_0 = arith.constant 0 : i32
    %c0_i32_1 = arith.constant 0 : i32
    return %arg0, %c0_i32, %arg1, %c0_i32_0 : i32, i32, i32, i32
  }
}

</mosaic_0001>

<bundles_post_ra>
// kernel: tpu_custom_call.1
= control target key start
LH: loop header
LB: loop body
LE: loop exit
PB: predicated region body
PF: predicated region fallthrough
CT: control target
= control target key end

     0   :  { %9 = vsyncpa [#allocation3], 0  ;;  %s1153_s0 = inlined_call_operand.hbm [shape: f32[2,4,1,256], index: 0, kind: input, shape index: {}]   ;;  %s1154_s1 = inlined_call_operand.hbm [shape: f32[2,1,1,256], index: 1, kind: input, shape index: {}]   ;;  %s1155_s2 = inlined_call_operand.hbm [shape: f32[2,1,1,256], index: 2, kind: output, shape index: {0}]   ;;  %s1156_s3 = inlined_call_operand.hbm [shape: f32[2,4,1,256], index: 3, kind: output, shape index: {1}]  }
   0x1   :  { %11 = vsyncpa [#allocation3 + $0x1], 0 }
   0x2   :  { %12 = vsyncpa [#allocation6], 0 }
   0x3   :  { %14 = vsyncpa [#allocation6 + $0x1], 0 }
   0x4   :  { %15 = vsyncpa [#allocation4], 0 }
   0x5   :  { %17 = vsyncpa [#allocation4 + $0x1], 0 }
   0x6   :  { %18 = vsyncpa [#allocation9], 0 }
   0x7   :  { %20 = vsyncpa [#allocation9 + $0x1], 0  ;;  %s871_s12 = smov 0   ;;  %s873_s13 = smov 0  }
   0x8   :  { %s875_s14 = smov 0   ;;  %s877_s15 = smov 0  }
   0x9   :  { %s879_s16 = smov 0   ;;  %s881_s17 = smov 0  }
   0xa LB: > { %s558_s18 = sadd.s32 4294967295, %s840_s17   ;;  %s559_s19 = sadd.s32 4294967294, %s840_s17   ;;  %s840_s17 = sphi %s881_s17, %s26_s17   ;;  %s836_s16 = sphi %s879_s16, %s1177_s16   ;;  %s832_s15 = sphi %s877_s15, %s1176_s15   ;;  %s828_s14 = sphi %s875_s14, %s1175_s14   ;;  %s824_s13 = sphi %s873_s13, %s1174_s13   ;;  %s820_s12 = sphi %s871_s12, %s1173_s12  }
   0xb   : > { %s38_s20 = sadd.s32 1, %s836_s16  ;;  %s47_s21 = sadd.s32 1, %s828_s14 }
   0xc   : > { %p40_p0 = scmp.ge.s32.totalorder %s38_s20, 2  ;;  %p54_p1 = scmp.ne.s32.totalorder %s828_s14, %s824_s13 }
   0xd   : > { %p55_p2 = scmp.eq.s32.totalorder %s840_s17, 0  ;;  %p60_p3 = scmp.ne.s32.totalorder %s824_s13, %s820_s12 }
   0xe   : > { %s1179_s20 = smov (%p40_p0, %s38_s20), 0  ;;  %p61_p5 = scmp.eq.s32.totalorder %s558_s18, 0 }
   0xf   : > { %p912_p4 = por %p55_p2, %p54_p1  ;;  %s42_s23 = ssub.s32 %s836_s16, %s1179_s20 }
  0x10   : > { %p114_p6 = scmp.eq.s32.totalorder %s558_s18, 1  ;;  %p45_p7 = scmp.eq.s32.totalorder %s42_s23, 0 }
  0x11   : > { %p918_p8 = por %p61_p5, %p60_p3  ;;  %p120_p10 = scmp.eq.s32.totalorder %s559_s19, 1 }
  0x12   : > { %p922_p9 = por %p114_p6, %p54_p1  ;;  %p607_p13 = scmp.lt.s32.totalorder %s840_s17, 2 }
  0x13   : > { %s1160_s24 = scalar_select %p918_p8, 1, 0 }
  0x14   : > { %s1161_s25 = scalar_select %p922_p9, 1, 0 }
  0x15   : > { %s927_s26 = scalar_select %p45_p7, %s828_s14, %s47_s21  }
  0x16   : > { %p929_p11 = por %p120_p10, %p60_p3  ;;  %s936_s28 = sand.u32 1, %s828_s14  }
  0x17   : > { %s562_s29 = sshll.u32 %s936_s28, 3  ;;  %s581_s30 = sshll.u32 %s836_s16, 7 }
  0x18   : > { %s1162_s27 = scalar_select %p929_p11, 1, 0 }
  0x19   : > { %s943_s6 = scalar_lea.hbm %s1153_s0, %s581_s30  ;;  %s172_s7 = scalar_lea.vmem [#allocation2], %s562_s29 }
  0x1a   : > { %s181_s8 = sshll.u32 %s172_s7, 4  ;;  %p949_p0 = pnand %p607_p13, %p912_p4  ;;  %s945_s8 = int_to_ptr.vmem [resolvable:$true] %s181_s8 }
  0x1b   : > { %s169_s10 = scalar_lea.sflag [#allocation3], %s936_s28  ;;  %s662_s11 = scalar_lea.hbm %s943_s6, 128 }
  0x1c   : > { %p663_p2 = scmp.ne.s32.totalorder %s943_s6, %s662_s11  ;;  %p664_p3 = pneg %p949_p0 }
  0x1d   : > { %s667_s21 = scalar_lea.hbm %s1153_s0, 256  ;;  %p668_p4 = scmp.lt.u32.totalorder %s943_s6, %s1153_s0 }
  0x1e   : > { %p665_p5 = pnand %p664_p3, %p663_p2  ;;  %p669_p7 = scmp.lt.u32.totalorder %s667_s21, %s662_s11 }
  0x1f   : > { %p671_p13 = scmp.lt.u32.totalorder %s662_s11, %s943_s6 }
  0x20   : > { %p666_p6 = pneg %p665_p5  ;;  %p670_p10 = por %p669_p7, %p668_p4 }
  0x22   : > { %p672_p12 = por %p671_p13, %p670_p10 }
  0x24   : > { %p673_p1 = pnand %p672_p12, %p666_p6 }
  0x26   : > { %676 = shalt.err (!%p673_p1)
}
  0x27   : > { %s677_s29 = scalar_lea.vmem %s945_s8, 128  ;;  %s842_s30 = smov [#allocation2]  }
  0x28   : > { %p678_p2 = scmp.ne.s32.totalorder %s945_s8, %s677_s29  ;;  %s682_s4 = sshll.u32 %s842_s30, 4  ;;  %s683_s4 = int_to_ptr.vmem [resolvable:$false] %s682_s4 }
  0x29   : > { %s684_s5 = scalar_lea.vmem %s683_s4, 256  ;;  %p685_p9 = scmp.lt.s32.totalorder %s945_s8, %s683_s4 }
  0x2a   : > { %p680_p5 = pnand %p678_p2, %p664_p3  ;;  %p686_p4 = scmp.lt.s32.totalorder %s684_s5, %s677_s29 }
  0x2c   : > { %p681_p11 = pneg %p680_p5  ;;  %p687_p7 = por %p686_p4, %p685_p9 }
  0x2e   : > { %p688_p10 = pnand %p687_p7, %p681_p11 }
  0x30   : > { %691 = shalt.err (!%p688_p10)
}
  0x31   : > { %s843_s7 = smov 32   ;;  %s844_s11 = smov 2  }
  0x32   : > { %596 = dma.hbm_to_vmem [thread:$0]  (!%p949_p0), %s943_s6, 128, %s945_s8, %s169_s10, %s843_s7, %s843_s7, %s844_s11  }
  0x33   : > { %p210_p12 = scmp.lt.s32.totalorder %s840_s17, 3  ;;  %s565_s18 = sshll.u32 %s936_s28, 1 }
  0x34   : > { %s582_s19 = sshll.u32 %s836_s16, 5  ;;  %p1164_p9 = scmp.ge.s32.totalorder %s840_s17, 1 }
  0x35   : > { %s994_s29 = scalar_lea.hbm %s1154_s1, %s582_s19  ;;  %s195_s30 = scalar_lea.vmem [#allocation5], %s565_s18 }
  0x36   : > { %p987_p11 = pnand %p1164_p9, %p210_p12  ;;  %s205_s4 = sshll.u32 %s195_s30, 4  ;;  %s206_s4 = int_to_ptr.vmem [resolvable:$true] %s205_s4 }
  0x37   : > { %s192_s6 = scalar_lea.sflag [#allocation6], %s936_s28  ;;  %s692_s8 = scalar_lea.hbm %s994_s29, 32 }
  0x38   : > { %s1165_s21 = scalar_select %p987_p11, 1, 0 }
  0x39   : > { %p693_p1 = scmp.ne.s32.totalorder %s994_s29, %s692_s8  ;;  %s697_s7 = scalar_lea.hbm %s1154_s1, 64 }
  0x3a   : > { %p698_p2 = scmp.lt.u32.totalorder %s994_s29, %s1154_s1  ;;  %p699_p5 = scmp.lt.u32.totalorder %s697_s7, %s692_s8 }
  0x3b   : > { %p695_p6 = pnand %p693_p1, %p664_p3  ;;  %p701_p7 = scmp.lt.u32.totalorder %s692_s8, %s994_s29 }
  0x3c   : > { %p700_p4 = por %p699_p5, %p698_p2 }
  0x3d   : > { %p696_p13 = pneg %p695_p6 }
  0x3e   : > { %p702_p10 = por %p701_p7, %p700_p4 }
  0x40   : > { %p703_p12 = pnand %p702_p10, %p696_p13 }
  0x42   : > { %706 = shalt.err (!%p703_p12)
}
  0x43   : > { %s707_s28 = scalar_lea.vmem %s206_s4, 32  ;;  %s845_s18 = smov [#allocation5]  }
  0x44   : > { %p708_p9 = scmp.ne.s32.totalorder %s206_s4, %s707_s28  ;;  %s712_s22 = sshll.u32 %s845_s18, 4  ;;  %s713_s22 = int_to_ptr.vmem [resolvable:$false] %s712_s22 }
  0x45   : > { %s714_s23 = scalar_lea.vmem %s713_s22, 64  ;;  %p715_p8 = scmp.lt.s32.totalorder %s206_s4, %s713_s22 }
  0x46   : > { %p710_p1 = pnand %p708_p9, %p664_p3  ;;  %p716_p11 = scmp.lt.s32.totalorder %s714_s23, %s707_s28 }
  0x48   : > { %p711_p6 = pneg %p710_p1  ;;  %p717_p2 = por %p716_p11, %p715_p8 }
  0x4a   : > { %p718_p5 = pnand %p717_p2, %p711_p6 }
  0x4c   : > { %721 = shalt.err (!%p718_p5)
}
  0x4d   : > { %599 = dma.hbm_to_vmem [thread:$0]  (!%p949_p0), %s994_s29, 32, %s206_s4, %s192_s6  }
  0x4e   : > { %p1166_p13 = scmp.ne.s32.totalorder %s1165_s21, 0 }
  0x4f   : > { %s1019_s30 = sand.u32 (!%p1166_p13), 1, %s824_s13   ;;  %p1167_p8 = scmp.ne.s32.totalorder (!%p1166_p13), %s1160_s24, 0 }
  0x50   : > { %214 = sbr.rel (%p1166_p13) target bundleno = 149 (0x95), region = 28  ;;  %s569_s8 = sshll.u32 (!%p1166_p13), %s1019_s30, 3 }
  0x51   : > { %s217_s10 = scalar_lea.sflag (!%p1166_p13), [#allocation3], %s1019_s30  ;;  %s220_s5 = scalar_lea.vmem (!%p1166_p13), [#allocation2], %s569_s8 }
  0x57   : > { %803 = dma.done.wait (%p1167_p8), %s217_s10, 128  }
  0x58   : > { %805 = vsyncadd (%p1167_p8), %s217_s10, 4294967168  ;;  %s570_s9 = sshll.u32 %s1019_s30, 1  ;;  %s226_s21 = scalar_lea.sflag [#allocation6], %s1019_s30 }
  0x59   : > { %s229_s29 = scalar_lea.vmem [#allocation5], %s570_s9 }
  0x5a   : > { %807 = dma.done.wait (%p1167_p8), %s226_s21, 32  }
  0x5b   : > { %809 = vsyncadd (%p1167_p8), %s226_s21, 4294967264  ;;  %v271_v0 = vlaneseq  ;;  %vm311_vm0 = vcmask 1040384   ;;  %v262_v5 = vld [vmem:[%s220_s5] sm:$0x3]  ;;  %v263_v6 = vld [vmem:[%s220_s5 + $0x2] sm:$0x3] }
  0x5c   : > { %v264_v7 = vld [vmem:[%s220_s5 + $0x4] sm:$0x3]  ;;  %v265_v8 = vld [vmem:[%s220_s5 + $0x6] sm:$0x3]  ;;  %v266_v17 = vld [vmem:[%s229_s29] sm:$0x3] }
  0x5d   : > { %v1037_v1 = vshrl.u32 %v271_v0, 7  ;;  %vm1041_vm1 = vcmp.lt.s32.totalorder %v271_v0, 256  ;;  %s261_s24 = scalar_lea.vmem [#allocation8], %s569_s8  ;;  %v361_v28 = vsub.f32 %v262_v5, %v266_v17  ;;  %v362_v29 = vsub.f32 %v263_v6, %v266_v17  ;;  %s584_s6 = sshll.u32 %s832_s15, 7 }
  0x5e   : > { %s410_s4 = sshll.u32 %s261_s24, 4  ;;  %v363_v32 = vsub.f32 %v264_v7, %v266_v17  ;;  %v364_v33 = vsub.f32 %v265_v8, %v266_v17  ;;  %s1061_s19 = scalar_lea.hbm %s1156_s3, %s584_s6  ;;  %s1056_s4 = int_to_ptr.vmem [resolvable:$true] %s410_s4 }
  0x5f   : > { %v273_v2 = vsub.s32 0, %v1037_v1  ;;  %v277_v3 = vsub.s32 1, %v1037_v1  ;;  %v365_v34 = vmul.f32 %v361_v28, %v361_v28  ;;  %v366_v35 = vmul.f32 %v362_v29, %v362_v29  ;;  %s379_s28 = scalar_lea.sflag [#allocation9], %s1019_s30  ;;  %s722_s18 = scalar_lea.vmem %s1056_s4, 128 }
  0x60   : > { %v367_v38 = vmul.f32 %v363_v32, %v363_v32  ;;  %v368_v39 = vmul.f32 %v364_v33, %v364_v33  ;;  %p723_p0 = scmp.ne.s32.totalorder %s1056_s4, %s722_s18  ;;  %p1170_p3 = scmp.ne.s32.totalorder %s1161_s25, 0 }
  0x61   : > { %v274_v9 = vrot.slane %v262_v5, %v273_v2  ;;  %v278_v10 = vrot.slane %v262_v5, %v277_v3  ;;  %v282_v11 = vrot.slane %v263_v6, %v273_v2  ;;  %v286_v12 = vrot.slane %v263_v6, %v277_v3  ;;  %369 = vst.msk [vmem:[%s261_s24] sm:$0x3] %vm1041_vm1, %v365_v34  ;;  %s846_s22 = smov [#allocation8]  }
  0x62   : > { %v290_v13 = vrot.slane %v264_v7, %v273_v2  ;;  %v294_v14 = vrot.slane %v264_v7, %v277_v3  ;;  %v298_v15 = vrot.slane %v265_v8, %v273_v2  ;;  %v302_v16 = vrot.slane %v265_v8, %v277_v3  ;;  %370 = vst.msk [vmem:[%s261_s24 + $0x2] sm:$0x3] %vm1041_vm1, %v366_v35  ;;  %p724_p11 = pnand %p723_p0, %p1170_p3  ;;  %s726_s23 = sshll.u32 %s846_s22, 4  ;;  %s727_s23 = int_to_ptr.vmem [resolvable:$false] %s726_s23 }
  0x63   : > { %v312_v18 = vsel %vm311_vm0, %v274_v9, 0.0  ;;  %v313_v19 = vsel %vm311_vm0, %v282_v11, 0.0  ;;  %v319_v20 = vsel %vm311_vm0, %v278_v10, 0.0  ;;  %v320_v21 = vsel %vm311_vm0, %v286_v12, 0.0  ;;  %371 = vst.msk [vmem:[%s261_s24 + $0x4] sm:$0x3] %vm1041_vm1, %v367_v38  ;;  %p729_p7 = scmp.lt.s32.totalorder %s1056_s4, %s727_s23 }
  0x64   : > { %v314_v22 = vadd.f32 %v313_v19, %v312_v18  ;;  %v315_v23 = vsel %vm311_vm0, %v290_v13, 0.0  ;;  %v317_v24 = vsel %vm311_vm0, %v298_v15, 0.0  ;;  %v321_v25 = vadd.f32 %v320_v21, %v319_v20  ;;  %372 = vst.msk [vmem:[%s261_s24 + $0x6] sm:$0x3] %vm1041_vm1, %v368_v39  ;;  %p725_p4 = pneg %p724_p11  ;;  %s728_s8 = scalar_lea.vmem %s727_s23, 256 }
  0x65   : > { %v322_v26 = vsel %vm311_vm0, %v294_v14, 0.0  ;;  %v324_v27 = vsel %vm311_vm0, %v302_v16, 0.0  ;;  %p730_p10 = scmp.lt.s32.totalorder %s728_s8, %s722_s18 }
  0x66   : > { %v316_v30 = vadd.f32 %v315_v23, %v314_v22  ;;  %v323_v31 = vadd.f32 %v322_v26, %v321_v25 }
  0x67   : > { %p731_p12 = por %p730_p10, %p729_p7 }
  0x68   : > { %v318_v36 = vadd.f32 %v317_v24, %v316_v30  ;;  %v325_v37 = vadd.f32 %v324_v27, %v323_v31 }
  0x69   : > { %p732_p9 = pnand %p731_p12, %p725_p4 }
  0x6a   : > { %v326_v40 = vmul.f32 0.25, %v318_v36  ;;  %v327_v41 = vmul.f32 0.25, %v325_v37 }
  0x6b   : > { %735 = shalt.err (!%p732_p9)
}
  0x6c   : > { %s736_s10 = scalar_lea.hbm %s1061_s19, 128  ;;  %s740_s29 = scalar_lea.hbm %s1156_s3, 256 }
  0x6d   : > { %p737_p1 = scmp.ne.s32.totalorder %s1061_s19, %s736_s10  ;;  %p741_p5 = scmp.lt.u32.totalorder %s1061_s19, %s1156_s3 }
  0x6e   : > { %p742_p13 = scmp.lt.u32.totalorder %s740_s29, %s736_s10  ;;  %p744_p0 = scmp.lt.u32.totalorder %s736_s10, %s1061_s19 }
  0x6f   : > { %p738_p6 = pnand %p737_p1, %p1170_p3 }
  0x70   : > { %p743_p8 = por %p742_p13, %p741_p5 }
  0x71   : > { %p739_p2 = pneg %p738_p6 }
  0x72   : > { %p745_p11 = por %p744_p0, %p743_p8 }
  0x74   : > { %p746_p4 = pnand %p745_p11, %p739_p2 }
  0x76   : > { %749 = shalt.err (!%p746_p4)
}
  0x77   : > { %s847_s7 = smov 32   ;;  %s848_s11 = smov 2   ;;  %v328_v42 = vmax.f32 %v326_v40, 0.0  ;;  %v329_v43 = vmax.f32 %v327_v41, 0.0  ;;  %v849_v44 = vmov 1966171168  }
  0x78   : > { %590 = dma.vmem_to_hbm [thread:$0]  (%p1170_p3), %s1056_s4, 128, %s1061_s19, %s379_s28, %s847_s7, %s847_s7, %s848_s11   ;;  %v342_v45 = vunpack.c.l.s4 %v849_v44 }
  0x79   : > { %v330_v46 = vmin.f32 %v328_v42, 1.0  ;;  %v331_v47 = vmin.f32 %v329_v43, 1.0  ;;  %s254_s4 = scalar_lea.vmem [#allocation7], %s570_s9  ;;  %s583_s28 = sshll.u32 %s832_s15, 5 }
  0x7a   : > { %v343_v50 = vunpack.c.0.s8 %v342_v45  ;;  %s395_s19 = sshll.u32 %s254_s4, 4  ;;  %s1104_s23 = scalar_lea.hbm %s1155_s2, %s583_s28  ;;  %s1099_s19 = int_to_ptr.vmem [resolvable:$true] %s395_s19 }
  0x7b   : > { %v332_v48 = vmul.f32 255.0, %v330_v46  ;;  %v333_v49 = vmul.f32 255.0, %v331_v47  ;;  %s374_s8 = scalar_lea.sflag [#allocation4], %s1019_s30  ;;  %s750_s10 = scalar_lea.vmem %s1099_s19, 32 }
  0x7c   : > { %v346_v55 = vsub.s32 %v343_v50, %v1037_v1  ;;  %p751_p7 = scmp.ne.s32.totalorder %s1099_s19, %s750_s10  ;;  %s850_s15 = smov [#allocation7]  }
  0x7d   : > { %v334_v51 = vfloor.f32 %v332_v48  ;;  %v335_v52 = vfloor.f32 %v333_v49  ;;  %s754_s9 = sshll.u32 %s850_s15, 4  ;;  %s755_s9 = int_to_ptr.vmem [resolvable:$false] %s754_s9 }
  0x7e   : > { %p752_p10 = pnand %p751_p7, %p1170_p3  ;;  %s756_s5 = scalar_lea.vmem %s755_s9, 64 }
  0x7f   : > { %v336_v53 = vmul.f32 0.003921569, %v334_v51  ;;  %v337_v54 = vmul.f32 0.003921569, %v335_v52  ;;  %p757_p9 = scmp.lt.s32.totalorder %s1099_s19, %s755_s9  ;;  %p758_p1 = scmp.lt.s32.totalorder %s756_s5, %s750_s10 }
  0x80   : > { %p753_p12 = pneg %p752_p10 }
  0x81   : > { %v340_v56 = vcombine.low %v336_v53, %v337_v54  ;;  %p759_p6 = por %p758_p1, %p757_p9 }
  0x83   : > { %v347_v57 = vrot.slane %v340_v56, %v346_v55  ;;  %p760_p2 = pnand %p759_p6, %p753_p12 }
  0x85   : > { %v354_v58 = vrot.slane %v347_v57, %v346_v55 }
  0x87   : > { %360 = vst.msk [vmem:[%s254_s4] sm:$0x3] %vm1041_vm1, %v354_v58 }
  0x88   : > { %763 = shalt.err (!%p760_p2)
}
  0x89   : > { %s764_s30 = scalar_lea.hbm %s1104_s23, 32  ;;  %s768_s24 = scalar_lea.hbm %s1155_s2, 64 }
  0x8a   : > { %p765_p5 = scmp.ne.s32.totalorder %s1104_s23, %s764_s30  ;;  %p769_p0 = scmp.lt.u32.totalorder %s1104_s23, %s1155_s2 }
  0x8b   : > { %p770_p11 = scmp.lt.u32.totalorder %s768_s24, %s764_s30  ;;  %p772_p7 = scmp.lt.u32.totalorder %s764_s30, %s1104_s23 }
  0x8c   : > { %p766_p13 = pnand %p765_p5, %p1170_p3 }
  0x8d   : > { %p771_p4 = por %p770_p11, %p769_p0 }
  0x8e   : > { %p767_p8 = pneg %p766_p13 }
  0x8f   : > { %p773_p10 = por %p772_p7, %p771_p4 }
  0x91   : > { %p774_p12 = pnand %p773_p10, %p767_p8 }
  0x93   : > { %777 = shalt.err (!%p774_p12)
}
  0x94   : > { %589 = dma.vmem_to_hbm [thread:$0]  (%p1170_p3), %s1099_s19, 32, %s1104_s23, %s374_s8  }
  0x95 PF: > { %s425_s11 = sand.u32 1, %s820_s12   ;;  %p1171_p9 = scmp.ne.s32.totalorder %s1162_s27, 0 }
  0x96   : > { %p1172_p1 = scmp.ge.s32.totalorder %s840_s17, 2  ;;  %s426_s4 = scalar_lea.sflag [#allocation4], %s425_s11 }
  0x98   : > { %p601_p6 = pnand %p1172_p1, %p1171_p9 }
  0x9a   : > { %811 = dma.done.wait (!%p601_p6), %s426_s4, 32  }
  0x9b   : > { %813 = vsyncadd (!%p601_p6), %s426_s4, 4294967264  ;;  %s435_s28 = scalar_lea.sflag [#allocation9], %s425_s11 }
  0x9c   : > { %815 = dma.done.wait (!%p601_p6), %s435_s28, 128  }
  0x9d   : > { %817 = vsyncadd (!%p601_p6), %s435_s28, 4294967168  ;;  %s26_s17 = sadd.s32 1, %s840_s17   ;;  %s1173_s12 = smov %s824_s13 }
  0x9e   : > { %p23_p2 = scmp.ge.s32.totalorder %s26_s17, 4   ;;  %s1174_s13 = smov %s828_s14 }
  0x9f   : > { %s1175_s14 = smov %s927_s26  ;;  %s1176_s15 = smov %s836_s16 }
  0xa0   : > { %s1177_s16 = smov %s1179_s20  ;;  %25 = sbr.rel (!%p23_p2) target bundleno = 10 (0xa), region = 103 }
  0xa7   :  { %440 = vsyncpa [#allocation3], 1 }
  0xa8   :  { %442 = vsyncpa [#allocation3 + $0x1], 1 }
  0xa9   :  { %443 = vsyncpa [#allocation6], 1 }
  0xaa   :  { %445 = vsyncpa [#allocation6 + $0x1], 1 }
  0xab   :  { %446 = vsyncpa [#allocation4], 1 }
  0xac   :  { %448 = vsyncpa [#allocation4 + $0x1], 1 }
  0xad   :  { %449 = vsyncpa [#allocation9], 1 }
  0xae   :  { %451 = vsyncpa [#allocation9 + $0x1], 1 }

</bundles_post_ra>
